<compile_context>
chip_gen: v7x
topology: tpu7x:2x2x1
jax: 0.10.0
libtpu: 0.0.40
codegen_flags: <defaults>
</compile_context>

<pallas_src>
import functools

import jax
import jax.numpy as jnp
from jax.experimental import pallas as pl
from jax.experimental.pallas import tpu as pltpu


def _round_up(x, m):
    return ((x + m - 1) // m) * m


def _policy_kernel(s_ref, w1_ref, b1_ref, w2_ref, b2_ref, w3_ref, b3_ref, o_ref):
    # Three MXU matmuls (bf16 operands, f32 accumulation) + VPU/EUP activations.
    h1 = jnp.dot(s_ref[...], w1_ref[...], preferred_element_type=jnp.float32)
    h1 = jnp.maximum(h1 + b1_ref[...], 0.0).astype(jnp.bfloat16)

    h2 = jnp.dot(h1, w2_ref[...], preferred_element_type=jnp.float32)
    h2 = jnp.maximum(h2 + b2_ref[...], 0.0).astype(jnp.bfloat16)

    pre = jnp.dot(h2, w3_ref[...], preferred_element_type=jnp.float32) + b3_ref[...]

    # Column 0 -> sigmoid, column 1 -> tanh, in a single EUP tanh pass:
    #   sigmoid(x) = 0.5 * (tanh(x / 2) + 1)
    lane = jax.lax.broadcasted_iota(jnp.int32, pre.shape, 1)
    is_lin = lane == 0
    t = jnp.tanh(jnp.where(is_lin, 0.5 * pre, pre))
    act = jnp.where(is_lin, 0.5 * t + 0.5, t)
    o_ref[...] = act.astype(o_ref.dtype)


@functools.partial(jax.jit, static_argnames=("block_b",))
def deterministic_policy_forward(s, w1, b1, w2, b2, w3, b3, *, block_b=4096):
    B, s_dim = s.shape
    h1_dim = w1.shape[1]
    h2_dim = w2.shape[1]
    a_dim = w3.shape[1]
    # The activation split below encodes the module's hard-coded 2-column
    # output (sigmoid on col 0, tanh on col 1).
    assert a_dim == 2, "DeterministicPolicy forward is defined for a_dim == 2"

    # bf16 MXU operands; biases stay f32 (added into the f32 accumulators).
    s16 = s.astype(jnp.bfloat16)
    w1_16 = w1.astype(jnp.bfloat16)
    w2_16 = w2.astype(jnp.bfloat16)
    w3_16 = w3.astype(jnp.bfloat16)

    # Batch tile: multiple of 8 sublanes, capped by block_b (VMEM budget) and
    # by ~ceil(B/2) so that medium/large batches produce >= 2 grid steps
    # (lets v7x shard the "parallel" batch axis across both TensorCores).
    # No batch padding: Pallas handles the ragged last block via pl.cdiv.
    tb_cap = max(8, _round_up(block_b, 8))
    tb_half = max(8, _round_up(-(-B // 2), 8))
    TB = min(tb_cap, tb_half)
    grid = (pl.cdiv(B, TB),)

    flops = 2 * B * (s_dim * h1_dim + h1_dim * h2_dim + h2_dim * a_dim)
    transcendentals = B * a_dim  # one tanh pass over the output tile
    bytes_accessed = (
        2 * (B * s_dim + s_dim * h1_dim + h1_dim * h2_dim + h2_dim * a_dim)  # bf16 in
        + 4 * (h1_dim + h2_dim + a_dim)                                       # f32 biases
        + 4 * B * a_dim                                                       # f32 out
    )

    out = pl.pallas_call(
        _policy_kernel,
        out_shape=jax.ShapeDtypeStruct((B, a_dim), jnp.float32),
        grid=grid,
        in_specs=[
            # Per-step batch tile of the state.
            pl.BlockSpec((TB, s_dim), lambda i: (i, 0)),
            # Weights / biases: constant block index -> stay VMEM-resident
            # across all grid steps (weight DMA amortized over the batch).
            pl.BlockSpec((s_dim, h1_dim), lambda i: (0, 0)),
            pl.BlockSpec((1, h1_dim), lambda i: (0, 0)),
            pl.BlockSpec((h1_dim, h2_dim), lambda i: (0, 0)),
            pl.BlockSpec((1, h2_dim), lambda i: (0, 0)),
            pl.BlockSpec((h2_dim, a_dim), lambda i: (0, 0)),
            pl.BlockSpec((1, a_dim), lambda i: (0, 0)),
        ],
        out_specs=pl.BlockSpec((TB, a_dim), lambda i: (i, 0)),
        compiler_params=pltpu.CompilerParams(
            dimension_semantics=("parallel",),  # v7x: shard batch across 2 TCs
        ),
        cost_estimate=pl.CostEstimate(
            flops=flops,
            transcendentals=transcendentals,
            bytes_accessed=bytes_accessed,
        ),
    )(s16, w1_16, b1, w2_16, b2, w3_16, b3)

    return out


def init_params(key, s_dim, a_dim, hidden_units=(128, 64)):
    """PyTorch-Linear-style uniform init: U(-1/sqrt(fan_in), 1/sqrt(fan_in))."""
    dims = [s_dim, hidden_units[0], hidden_units[1], a_dim]
    params = []
    for i in range(3):
        fan_in, fan_out = dims[i], dims[i + 1]
        key, kw, kb = jax.random.split(key, 3)
        bound = 1.0 / jnp.sqrt(fan_in)
        w = jax.random.uniform(kw, (fan_in, fan_out), jnp.float32, -bound, bound)
        b = jax.random.uniform(kb, (1, fan_out), jnp.float32, -bound, bound)
        params += [w, b]
    return params


if __name__ == "__main__":
    key = jax.random.PRNGKey(0)
    B, s_dim, a_dim = 8, 32, 2
    hidden_units = (128, 64)

    key, k_s = jax.random.split(key)
    s = jax.random.normal(k_s, (B, s_dim), jnp.float32)

    w1, b1, w2, b2, w3, b3 = init_params(key, s_dim, a_dim, hidden_units)

    out = deterministic_policy_forward(s, w1, b1, w2, b2, w3, b3)
    out = jax.block_until_ready(out)
    assert out.shape == (B, a_dim)

    # Reference #1: pure-JAX mirror of the kernel's bf16-operand matmuls.
    s16 = s.astype(jnp.bfloat16)
    h1 = jnp.maximum(
        jnp.dot(s16, w1.astype(jnp.bfloat16), preferred_element_type=jnp.float32) + b1,
        0.0,
    ).astype(jnp.bfloat16)
    h2 = jnp.maximum(
        jnp.dot(h1, w2.astype(jnp.bfloat16), preferred_element_type=jnp.float32) + b2,
        0.0,
    ).astype(jnp.bfloat16)
    pre = jnp.dot(h2, w3.astype(jnp.bfloat16), preferred_element_type=jnp.float32) + b3
    ref_bf16 = jnp.concatenate(
        [jax.nn.sigmoid(pre[:, 0:1]), jnp.tanh(pre[:, 1:2])], axis=1
    )
    assert jnp.allclose(out, ref_bf16, atol=2e-3, rtol=2e-3)

    # Reference #2: full-f32 math (loose tolerance, bf16 matmul operands).
    h1f = jnp.maximum(s @ w1 + b1, 0.0)
    h2f = jnp.maximum(h1f @ w2 + b2, 0.0)
    pref = h2f @ w3 + b3
    ref_f32 = jnp.concatenate(
        [jax.nn.sigmoid(pref[:, 0:1]), jnp.tanh(pref[:, 1:2])], axis=1
    )
    assert jnp.allclose(out, ref_f32, atol=2e-2, rtol=2e-2)

    print("KERNEL_OK")
</pallas_src>

<mosaic_0001>
module attributes {stable_mosaic.version = 11 : i64} {
  func.func @_policy_kernel(%arg0: i32, %arg1: memref<8x32xbf16, #tpu.memory_space<vmem>>, %arg2: memref<32x128xbf16, #tpu.memory_space<vmem>>, %arg3: memref<1x128xf32, #tpu.memory_space<vmem>>, %arg4: memref<128x64xbf16, #tpu.memory_space<vmem>>, %arg5: memref<1x64xf32, #tpu.memory_space<vmem>>, %arg6: memref<64x2xbf16, #tpu.memory_space<vmem>>, %arg7: memref<1x2xf32, #tpu.memory_space<vmem>>, %arg8: memref<8x2xf32, #tpu.memory_space<vmem>>) attributes {dimension_semantics = [#tpu.dimension_semantics<parallel>], iteration_bounds = array<i64: 1>, scalar_prefetch = 0 : i64, scratch_operands = 0 : i64, tpu.core_type = #tpu.core_type<tc>, window_params = [{transform_indices = @transform_0, window_bounds = array<i64: 8, 32>}, {pipeline_mode = #tpu.pipeline_mode<synchronous>, transform_indices = @transform_1, window_bounds = array<i64: 32, 128>}, {pipeline_mode = #tpu.pipeline_mode<synchronous>, transform_indices = @transform_2, window_bounds = array<i64: 1, 128>}, {pipeline_mode = #tpu.pipeline_mode<synchronous>, transform_indices = @transform_3, window_bounds = array<i64: 128, 64>}, {pipeline_mode = #tpu.pipeline_mode<synchronous>, transform_indices = @transform_4, window_bounds = array<i64: 1, 64>}, {pipeline_mode = #tpu.pipeline_mode<synchronous>, transform_indices = @transform_5, window_bounds = array<i64: 64, 2>}, {pipeline_mode = #tpu.pipeline_mode<synchronous>, transform_indices = @transform_6, window_bounds = array<i64: 1, 2>}, {transform_indices = @transform_7, window_bounds = array<i64: 8, 2>}]} {
    %c0 = arith.constant 0 : index
    %c0_0 = arith.constant 0 : index
    %0 = vector.load %arg1[%c0, %c0_0] : memref<8x32xbf16, #tpu.memory_space<vmem>>, vector<8x32xbf16>
    %c0_1 = arith.constant 0 : index
    %c0_2 = arith.constant 0 : index
    %1 = vector.load %arg2[%c0_1, %c0_2] : memref<32x128xbf16, #tpu.memory_space<vmem>>, vector<32x128xbf16>
    %cst = arith.constant dense<0.000000e+00> : vector<8x128xf32>
    %2 = tpu.matmul %0, %1, %cst {dimension_numbers = #tpu.dot_dimension_numbers<[1], [0], [0], [1], [0, 0, 1, 1], [], []>} : vector<8x32xbf16>, vector<32x128xbf16>, vector<8x128xf32> -> vector<8x128xf32>
    %c0_3 = arith.constant 0 : index
    %c0_4 = arith.constant 0 : index
    %3 = vector.load %arg3[%c0_3, %c0_4] : memref<1x128xf32, #tpu.memory_space<vmem>>, vector<1x128xf32>
    %4 = vector.broadcast %3 : vector<1x128xf32> to vector<8x128xf32>
    %5 = arith.addf %2, %4 : vector<8x128xf32>
    %cst_5 = arith.constant 0.000000e+00 : f32
    %6 = vector.broadcast %cst_5 : f32 to vector<8x128xf32>
    %7 = arith.maximumf %5, %6 : vector<8x128xf32>
    %8 = arith.truncf %7 : vector<8x128xf32> to vector<8x128xbf16>
    %c0_6 = arith.constant 0 : index
    %c0_7 = arith.constant 0 : index
    %9 = vector.load %arg4[%c0_6, %c0_7] : memref<128x64xbf16, #tpu.memory_space<vmem>>, vector<128x64xbf16>
    %cst_8 = arith.constant dense<0.000000e+00> : vector<8x64xf32>
    %10 = tpu.matmul %8, %9, %cst_8 {dimension_numbers = #tpu.dot_dimension_numbers<[1], [0], [0], [1], [0, 0, 1, 1], [], []>} : vector<8x128xbf16>, vector<128x64xbf16>, vector<8x64xf32> -> vector<8x64xf32>
    %c0_9 = arith.constant 0 : index
    %c0_10 = arith.constant 0 : index
    %11 = vector.load %arg5[%c0_9, %c0_10] : memref<1x64xf32, #tpu.memory_space<vmem>>, vector<1x64xf32>
    %12 = vector.broadcast %11 : vector<1x64xf32> to vector<8x64xf32>
    %13 = arith.addf %10, %12 : vector<8x64xf32>
    %cst_11 = arith.constant 0.000000e+00 : f32
    %14 = vector.broadcast %cst_11 : f32 to vector<8x64xf32>
    %15 = arith.maximumf %13, %14 : vector<8x64xf32>
    %16 = arith.truncf %15 : vector<8x64xf32> to vector<8x64xbf16>
    %c0_12 = arith.constant 0 : index
    %c0_13 = arith.constant 0 : index
    %17 = vector.load %arg6[%c0_12, %c0_13] : memref<64x2xbf16, #tpu.memory_space<vmem>>, vector<64x2xbf16>
    %cst_14 = arith.constant dense<0.000000e+00> : vector<8x2xf32>
    %18 = tpu.matmul %16, %17, %cst_14 {dimension_numbers = #tpu.dot_dimension_numbers<[1], [0], [0], [1], [0, 0, 1, 1], [], []>} : vector<8x64xbf16>, vector<64x2xbf16>, vector<8x2xf32> -> vector<8x2xf32>
    %c0_15 = arith.constant 0 : index
    %c0_16 = arith.constant 0 : index
    %19 = vector.load %arg7[%c0_15, %c0_16] : memref<1x2xf32, #tpu.memory_space<vmem>>, vector<1x2xf32>
    %20 = vector.broadcast %19 : vector<1x2xf32> to vector<8x2xf32>
    %21 = arith.addf %18, %20 : vector<8x2xf32>
    %22 = tpu.iota {dimensions = array<i32: 1>} : vector<8x2xi32>
    %c0_i32 = arith.constant 0 : i32
    %23 = vector.broadcast %c0_i32 : i32 to vector<8x2xi32>
    %24 = arith.cmpi eq, %22, %23 : vector<8x2xi32>
    %cst_17 = arith.constant 5.000000e-01 : f32
    %25 = vector.broadcast %cst_17 : f32 to vector<8x2xf32>
    %26 = arith.mulf %25, %21 : vector<8x2xf32>
    %27 = arith.select %24, %26, %21 : vector<8x2xi1>, vector<8x2xf32>
    %28 = math.tanh %27 : vector<8x2xf32>
    %cst_18 = arith.constant 5.000000e-01 : f32
    %29 = vector.broadcast %cst_18 : f32 to vector<8x2xf32>
    %30 = arith.mulf %29, %28 : vector<8x2xf32>
    %cst_19 = arith.constant 5.000000e-01 : f32
    %31 = vector.broadcast %cst_19 : f32 to vector<8x2xf32>
    %32 = arith.addf %30, %31 : vector<8x2xf32>
    %33 = arith.select %24, %32, %28 : vector<8x2xi1>, vector<8x2xf32>
    %c0_20 = arith.constant 0 : index
    %c0_21 = arith.constant 0 : index
    %34 = vector.load %arg8[%c0_20, %c0_21] : memref<8x2xf32, #tpu.memory_space<vmem>>, vector<8x2xf32>
    tpu.vector_store %arg8[%c0_20, %c0_21], %33 {strides = array<i32>} : memref<8x2xf32, #tpu.memory_space<vmem>>, vector<8x2xf32>,
    return
  }
  func.func @transform_0(%arg0: i32) -> (i32, i32) {
    %c0_i32 = arith.constant 0 : i32
    %c0_i32_0 = arith.constant 0 : i32
    return %arg0, %c0_i32 : i32, i32
  }
  func.func @transform_1(%arg0: i32) -> (i32, i32) {
    %c0_i32 = arith.constant 0 : i32
    %c0_i32_0 = arith.constant 0 : i32
    %c0_i32_1 = arith.constant 0 : i32
    return %c0_i32, %c0_i32_0 : i32, i32
  }
  func.func @transform_2(%arg0: i32) -> (i32, i32) {
    %c0_i32 = arith.constant 0 : i32
    %c0_i32_0 = arith.constant 0 : i32
    %c0_i32_1 = arith.constant 0 : i32
    return %c0_i32, %c0_i32_0 : i32, i32
  }
  func.func @transform_3(%arg0: i32) -> (i32, i32) {
    %c0_i32 = arith.constant 0 : i32
    %c0_i32_0 = arith.constant 0 : i32
    %c0_i32_1 = arith.constant 0 : i32
    return %c0_i32, %c0_i32_0 : i32, i32
  }
  func.func @transform_4(%arg0: i32) -> (i32, i32) {
    %c0_i32 = arith.constant 0 : i32
    %c0_i32_0 = arith.constant 0 : i32
    %c0_i32_1 = arith.constant 0 : i32
    return %c0_i32, %c0_i32_0 : i32, i32
  }
  func.func @transform_5(%arg0: i32) -> (i32, i32) {
    %c0_i32 = arith.constant 0 : i32
    %c0_i32_0 = arith.constant 0 : i32
    %c0_i32_1 = arith.constant 0 : i32
    return %c0_i32, %c0_i32_0 : i32, i32
  }
  func.func @transform_6(%arg0: i32) -> (i32, i32) {
    %c0_i32 = arith.constant 0 : i32
    %c0_i32_0 = arith.constant 0 : i32
    %c0_i32_1 = arith.constant 0 : i32
    return %c0_i32, %c0_i32_0 : i32, i32
  }
  func.func @transform_7(%arg0: i32) -> (i32, i32) {
    %c0_i32 = arith.constant 0 : i32
    %c0_i32_0 = arith.constant 0 : i32
    return %arg0, %c0_i32 : i32, i32
  }
}

</mosaic_0001>

<bundles_post_ra>
// kernel: deterministic_policy_forward.1
= control target key start
LH: loop header
LB: loop body
LE: loop exit
PB: predicated region body
PF: predicated region fallthrough
CT: control target
= control target key end

     0   :  { %v402_v0 = vmov 0.0   ;;  %vm403_vm0 = vmmov 0   ;;  %vm51_vm1 = vcmask 261120   ;;  %vm249_vm2 = vcmask 523264   ;;  %s504_s1 = inlined_call_operand.vmem [shape: bf16[32,128], index: 1, kind: input, shape index: {}]   ;;  %s505_s3 = inlined_call_operand.vmem [shape: bf16[128,64], index: 3, kind: input, shape index: {}]   ;;  %s506_s0 = inlined_call_operand.vmem [shape: bf16[8,32], index: 0, kind: input, shape index: {}]   ;;  %s507_s5 = inlined_call_operand.vmem [shape: bf16[64,2], index: 5, kind: input, shape index: {}]   ;;  %s508_s2 = inlined_call_operand.vmem [shape: f32[1,128], index: 2, kind: input, shape index: {}]   ;;  %s509_s4 = inlined_call_operand.vmem [shape: f32[1,64], index: 4, kind: input, shape index: {}]   ;;  %s510_s6 = inlined_call_operand.vmem [shape: f32[1,2], index: 6, kind: input, shape index: {}]   ;;  %s511_s7 = inlined_call_operand.vmem [shape: f32[8,2], index: 7, kind: output, shape index: {}]  }
   0x1   :  { %344 = vmatprep.subr.bf16.mxu0 %v402_v0  ;;  %v386_v1 = vld [vmem:[%s504_s1] sm:$0xff]   ;;  %348 = vmatprep.mubr.msk.bf16.mxu0 %vm403_vm0, %v402_v0  ;;  %v387_v2 = vld [vmem:[%s504_s1 + $0x8] sm:$0xff]   ;;  %v390_v6 = vld [vmem:[%s505_s3 + $0x10] sm:$0xff]   ;;  %v293_v32 = vlaneseq  ;;  %vm302_vm4 = vcmask 15360  }
   0x2   :  { %352 = vmatprep.subr.bf16.mxu1 %v402_v0  ;;  %368 = vmatprep.mubr.msk.bf16.mxu1 %vm403_vm0, %v402_v0  ;;  %v388_v3 = vld [vmem:[%s505_s3] sm:$0xff]   ;;  %v389_v4 = vld [vmem:[%s505_s3 + $0x8] sm:$0xff]   ;;  %v391_v7 = vld [vmem:[%s505_s3 + $0x18] sm:$0xff]  }
   0x3   :  { %345 = vmatpush3.bf16.msra.mxu0 %v386_v1  ;;  %353 = vmatpush3.bf16.msra.mxu1 %v388_v3  ;;  %v27_v5 = vld [vmem:[%s506_s0] sm:$0xf]  ;;  %v393_v9 = vld [vmem:[%s505_s3 + $0x28] sm:$0xff]   ;;  %v394_v10 = vld [vmem:[%s505_s3 + $0x30] sm:$0xff]   ;;  %v294_v34 = vand.u32 127, %v293_v32 }
   0x4   :  { %346 = vmatprep.subr.bf16.mxu0 %v402_v0  ;;  %354 = vmatprep.subr.bf16.mxu1 %v402_v0  ;;  %v392_v8 = vld [vmem:[%s505_s3 + $0x20] sm:$0xff]   ;;  %v395_v11 = vld [vmem:[%s505_s3 + $0x38] sm:$0xff]   ;;  %v397_v13 = vld [vmem:[%s507_s5 + $0x8] sm:$0xff]  }
   0x5   :  { %v396_v12 = vld [vmem:[%s507_s5] sm:$0xff]   ;;  %v398_v22 = vld [vmem:[%s507_s5 + $0x10] sm:$0xff]   ;;  %v399_v23 = vld [vmem:[%s507_s5 + $0x18] sm:$0xff]   ;;  %vm295_vm3 = vcmp.eq.s32.totalorder %v294_v34, 0 }
   0x6   :  { %v308_v14 = vld [vmem:[%s508_s2] ss:$0 sm:$0xff] }
   0x7   :  { %347 = vmatpush3.bf16.msra.mxu0 %v387_v2  ;;  %355 = vmatpush3.bf16.msra.mxu1 %v389_v4  ;;  %v312_v24 = vld [vmem:[%s509_s4] ss:$0 sm:$0xff] }
   0x8   :  { %372 = vmatprep.subr.bf16.mxu0 %v402_v0  ;;  %356 = vmatprep.subr.bf16.mxu1 %v402_v0  ;;  %v321_v33 = vld [vmem:[%s510_s6] ss:$0 sm:$0xff] }
   0xa   :  { %349 = vmatmul.mubr.msk.bf16.vlgmr.msra.gmra.mrb[0].mxu0 %vm51_vm1, %v27_v5 }
   0xb   :  { %380 = vmatprep.mubr.msk.bf16.mxu0 %vm403_vm0, %v402_v0  ;;  %357 = vmatpush3.bf16.msra.mxu1 %v390_v6 }
   0xc   :  { %358 = vmatprep.subr.bf16.mxu1 %v402_v0  ;;  %373 = vmatpush3.bf16.msra.mxu0 %v396_v12 }
   0xd   :  { %374 = vmatprep.subr.bf16.mxu0 %v402_v0 }
   0xf   :  { %359 = vmatpush3.bf16.msra.mxu1 %v391_v7 }
  0x10   :  { %360 = vmatprep.subr.bf16.mxu1 %v402_v0  ;;  %375 = vmatpush3.bf16.msra.mxu0 %v397_v13 }
  0x11   :  { %376 = vmatprep.subr.bf16.mxu0 %v402_v0 }
  0x13   :  { %361 = vmatpush3.bf16.msra.mxu1 %v392_v8 }
  0x14   :  { %362 = vmatprep.subr.bf16.mxu1 %v402_v0  ;;  %377 = vmatpush3.bf16.msra.mxu0 %v398_v22 }
  0x15   :  { %378 = vmatprep.subr.bf16.mxu0 %v402_v0 }
  0x17   :  { %363 = vmatpush3.bf16.msra.mxu1 %v393_v9 }
  0x18   :  { %364 = vmatprep.subr.bf16.mxu1 %v402_v0  ;;  %379 = vmatpush3.bf16.msra.mxu0 %v399_v23 }
  0x1b   :  { %365 = vmatpush3.bf16.msra.mxu1 %v394_v10 }
  0x1c   :  { %366 = vmatprep.subr.bf16.mxu1 %v402_v0 }
  0x1f   :  { %367 = vmatpush3.bf16.msra.mxu1 %v395_v11 }
  0xdd   :  { %v89_v15 = vpop.f32.mrb[0].mxu0 }
  0xde   :  { %v90_v16 = vadd.f32 %v308_v14, %v89_v15  ;;  %v350_v17 = vpop.f32.mrb[1].mxu0 }
  0xdf   :  { %v92_v18 = vpop.f32.mrb[2].mxu0 }
  0xe0   :  { %v95_v19 = vmax.f32 %v90_v16, 0.0  ;;  %v351_v20 = vpop.f32.mrb[3].mxu0 }
  0xe2   :  { %v96_v21 = vpack.c.bf16 %v95_v19, %v95_v19 }
  0xe4   :  { %369 = vmatmul.mubr.bf16.vlgmr.msra.gmra.mrb[0].mxu1 %v96_v21 }
 0x1b7   :  { %v202_v25 = vpop.f32.mrb[0].mxu1 }
 0x1b8   :  { %v203_v26 = vadd.f32 %v312_v24, %v202_v25  ;;  %v370_v27 = vpop.f32.mrb[1].mxu1 }
 0x1b9   :  { %v205_v28 = vpop.f32.mrb[2].mxu1 }
 0x1ba   :  { %v208_v29 = vmax.f32 %v203_v26, 0.0  ;;  %v371_v30 = vpop.f32.mrb[3].mxu1 }
 0x1bc   :  { %v209_v31 = vpack.c.bf16 %v208_v29, %v208_v29 }
 0x1be   :  { %381 = vmatmul.mubr.msk.bf16.vlgmr.msra.gmra.mrb[4].mxu0 %vm249_vm2, %v209_v31 }
 0x291   :  { %v287_v35 = vpop.f32.mrb[4].mxu0 }
 0x292   :  { %v288_v36 = vadd.f32 %v321_v33, %v287_v35  ;;  %v382_v37 = vpop.f32.mrb[5].mxu0 }
 0x293   :  { %v290_v38 = vpop.f32.mrb[6].mxu0 }
 0x294   :  { %v296_v39 = vmul.f32 0.5, %v288_v36  ;;  %v383_v40 = vpop.f32.mrb[7].mxu0 }
 0x296   :  { %v297_v41 = vsel %vm295_vm3, %v296_v39, %v288_v36 }
 0x297   :  { %400 = vtanh.f32 %v297_v41 }
 0x2a1   :  { %v401_v42 = vpop.eup %400 }
 0x2a2   :  { %v299_v43 = vmul.f32 0.5, %v401_v42 }
 0x2a4   :  { %v300_v44 = vadd.f32 0.5, %v299_v43 }
 0x2a6   :  { %v301_v45 = vsel %vm295_vm3, %v300_v44, %v401_v42 }
 0x2a7   :  { %303 = vst.msk [vmem:[%s511_s7] sm:$0xff] %vm302_vm4, %v301_v45 }

</bundles_post_ra>
